<compile_context>
chip_gen: v7x
topology: tpu7x:2x2x1
jax: 0.10.0
libtpu: 0.0.40
codegen_flags: <defaults>
</compile_context>

<pallas_src>
from functools import partial

import jax
import jax.numpy as jnp
from jax import lax
from jax.experimental import pallas as pl
from jax.experimental.pallas import tpu as pltpu

EPS = 1e-5


# ----------------------------------------------------------------------------
# helpers
# ----------------------------------------------------------------------------
def _round_up(x, m):
    return ((x + m - 1) // m) * m


def _pick_tk(k_pad, max_tk=1024):
    """Largest K tile that is a multiple of 128, divides k_pad and <= max_tk."""
    if k_pad <= max_tk:
        return k_pad
    best = 128
    t = 256
    while t <= max_tk:
        if k_pad % t == 0:
            best = t
        t += 128
    return best


# ----------------------------------------------------------------------------
# Pallas kernels
# ----------------------------------------------------------------------------
def _matmul_stats_kernel(p_ref, w_ref, y_ref, ssum_ref, ssq_ref, acc_ref):
    """Tiled conv-as-matmul. Grid = (m_tiles, k_tiles).

    Accumulates P @ W over the K axis into an f32 VMEM scratch; on the last K
    step writes the f32 conv output tile plus per-channel partial sum /
    sum-of-squares for this M tile (BN statistics pass 1).
    """
    k = pl.program_id(1)

    @pl.when(k == 0)
    def _init():
        acc_ref[...] = jnp.zeros_like(acc_ref)

    acc_ref[...] += jnp.dot(p_ref[...], w_ref[...],
                            preferred_element_type=jnp.float32)

    @pl.when(k == pl.num_programs(1) - 1)
    def _finalize():
        y = acc_ref[...]
        y_ref[...] = y.astype(y_ref.dtype)
        s = jnp.sum(y, axis=0, keepdims=True)        # (1, C)
        q = jnp.sum(y * y, axis=0, keepdims=True)    # (1, C)
        ssum_ref[...] = jnp.broadcast_to(s, ssum_ref.shape)
        ssq_ref[...] = jnp.broadcast_to(q, ssq_ref.shape)


def _bn_act_kernel(y_ref, scale_ref, shift_ref, out_ref, *, relu):
    z = y_ref[...] * scale_ref[...] + shift_ref[...]
    if relu:
        z = jnp.maximum(z, 0.0)
    out_ref[...] = z.astype(out_ref.dtype)


def _bn_add_act_kernel(y_ref, scale_ref, shift_ref, res_ref, out_ref, *, relu):
    z = y_ref[...] * scale_ref[...] + shift_ref[...] + res_ref[...]
    if relu:
        z = jnp.maximum(z, 0.0)
    out_ref[...] = z.astype(out_ref.dtype)


def _linear_kernel(x_ref, w_ref, b_ref, o_ref):
    o_ref[...] = (jnp.dot(x_ref[...], w_ref[...],
                          preferred_element_type=jnp.float32)
                  + b_ref[...]).astype(o_ref.dtype)


# ----------------------------------------------------------------------------
# ConvBn2d (+ optional residual add + optional ReLU) wrapper
# ----------------------------------------------------------------------------
@partial(jax.jit, static_argnames=("stride", "padding", "relu"))
def conv_bn_act(x_nhwc, weight, gamma, beta, residual=None, *,
                stride=1, padding=1, relu=False):
    """Conv2d (bias=False) + BatchNorm2d (training-mode batch stats)
    [+ residual add] [+ ReLU].  x_nhwc: (N,H,W,Cin) f32; weight: (Cout,Cin,KH,KW).
    Returns NHWC f32 of shape (N, Hout, Wout, Cout)."""
    N, H, W, Cin = x_nhwc.shape
    Cout, _, KH, KW = weight.shape
    Hout = (H + 2 * padding - KH) // stride + 1
    Wout = (W + 2 * padding - KW) // stride + 1
    M = N * Hout * Wout
    K = KH * KW * Cin

    # ---- glue: im2col in bf16 (streamed tile-by-tile by the Pallas pipeline)
    xb = x_nhwc.astype(jnp.bfloat16)
    if padding:
        xb = jnp.pad(xb, ((0, 0), (padding, padding), (padding, padding), (0, 0)))
    taps = []
    for dh in range(KH):
        for dw in range(KW):
            taps.append(xb[:, dh:dh + stride * Hout:stride,
                            dw:dw + stride * Wout:stride, :])
    patches = jnp.stack(taps, axis=3).reshape(M, K)          # (M, K) bf16
    w_flat = jnp.transpose(weight, (2, 3, 1, 0)).reshape(K, Cout)
    w_flat = w_flat.astype(jnp.bfloat16)

    # ---- tiling: lane/sublane friendly, fits comfortably in VMEM on v5e/v6e/v7x
    C_pad = _round_up(Cout, 128)
    TM = min(512, _round_up(M, 8))
    M_pad = _round_up(M, TM)
    K_pad = _round_up(K, 128)
    TK = _pick_tk(K_pad)
    n_mt = M_pad // TM
    n_kt = K_pad // TK

    patches = jnp.pad(patches, ((0, M_pad - M), (0, K_pad - K)))
    w_flat = jnp.pad(w_flat, ((0, K_pad - K), (0, C_pad - Cout)))

    cost = pl.CostEstimate(
        flops=2 * M_pad * K_pad * C_pad,
        transcendentals=0,
        bytes_accessed=(M_pad * K_pad * 2 + K_pad * C_pad * 2
                        + M_pad * C_pad * 4),
    )

    # ---- pass 1: tiled MXU matmul + per-tile BN partial statistics ----------
    y, ssum, ssq = pl.pallas_call(
        _matmul_stats_kernel,
        out_shape=(
            jax.ShapeDtypeStruct((M_pad, C_pad), jnp.float32),
            jax.ShapeDtypeStruct((n_mt * 8, C_pad), jnp.float32),
            jax.ShapeDtypeStruct((n_mt * 8, C_pad), jnp.float32),
        ),
        grid=(n_mt, n_kt),
        in_specs=[
            pl.BlockSpec((TM, TK), lambda m, k: (m, k)),
            pl.BlockSpec((TK, C_pad), lambda m, k: (k, 0)),
        ],
        out_specs=(
            pl.BlockSpec((TM, C_pad), lambda m, k: (m, 0)),
            pl.BlockSpec((8, C_pad), lambda m, k: (m, 0)),
            pl.BlockSpec((8, C_pad), lambda m, k: (m, 0)),
        ),
        scratch_shapes=[pltpu.VMEM((TM, C_pad), jnp.float32)],
        compiler_params=pltpu.CompilerParams(
            dimension_semantics=("parallel", "arbitrary")),
        cost_estimate=cost,
    )(patches, w_flat)

    # ---- tiny glue reduction: global batch stats -> per-channel scale/shift -
    total = jnp.sum(ssum[0::8, :], axis=0)                   # (C_pad,)
    total_sq = jnp.sum(ssq[0::8, :], axis=0)
    mean = total / M                                          # true M, not M_pad
    var = jnp.maximum(total_sq / M - mean * mean, 0.0)
    gamma_p = jnp.pad(gamma.astype(jnp.float32), (0, C_pad - Cout))
    beta_p = jnp.pad(beta.astype(jnp.float32), (0, C_pad - Cout))
    scale = (gamma_p * lax.rsqrt(var + EPS)).reshape(1, C_pad)
    shift = (beta_p - mean * gamma_p * lax.rsqrt(var + EPS)).reshape(1, C_pad)

    # ---- pass 2: tiled normalize (+ residual add) (+ ReLU) ------------------
    inputs = [y, scale, shift]
    in_specs = [
        pl.BlockSpec((TM, C_pad), lambda m: (m, 0)),
        pl.BlockSpec((1, C_pad), lambda m: (0, 0)),
        pl.BlockSpec((1, C_pad), lambda m: (0, 0)),
    ]
    if residual is not None:
        res = residual.astype(jnp.float32).reshape(M, Cout)
        res = jnp.pad(res, ((0, M_pad - M), (0, C_pad - Cout)))
        inputs.append(res)
        in_specs.append(pl.BlockSpec((TM, C_pad), lambda m: (m, 0)))
        kern = partial(_bn_add_act_kernel, relu=relu)
    else:
        kern = partial(_bn_act_kernel, relu=relu)

    out = pl.pallas_call(
        kern,
        out_shape=jax.ShapeDtypeStruct((M_pad, C_pad), jnp.float32),
        grid=(n_mt,),
        in_specs=in_specs,
        out_specs=pl.BlockSpec((TM, C_pad), lambda m: (m, 0)),
        compiler_params=pltpu.CompilerParams(
            dimension_semantics=("parallel",)),
    )(*inputs)

    return out[:M, :Cout].reshape(N, Hout, Wout, Cout)


@jax.jit
def linear_pallas(x, w, b):
    """x: (N, F), w: (F, C), b: (C,) -> (N, C).  Tiny, single-block matmul."""
    N, F = x.shape
    C = w.shape[1]
    return pl.pallas_call(
        _linear_kernel,
        out_shape=jax.ShapeDtypeStruct((N, C), jnp.float32),
        grid=(1,),
        in_specs=[
            pl.BlockSpec((N, F), lambda i: (0, 0)),
            pl.BlockSpec((F, C), lambda i: (0, 0)),
            pl.BlockSpec((1, C), lambda i: (0, 0)),
        ],
        out_specs=pl.BlockSpec((N, C), lambda i: (0, 0)),
    )(x.astype(jnp.float32), w.astype(jnp.float32), b.reshape(1, C).astype(jnp.float32))


# ----------------------------------------------------------------------------
# ResNet34 forward (Pallas kernels + small lax/jnp glue)
# ----------------------------------------------------------------------------
def _basic_block_fwd(x, p, stride, is_shortcut):
    z = conv_bn_act(x, p["w1"], p["g1"], p["b1"], None,
                    stride=stride, padding=1, relu=True)
    if is_shortcut:
        sc = conv_bn_act(x, p["ws"], p["gs"], p["bs"], None,
                         stride=stride, padding=0, relu=False)
    else:
        sc = x
    # conv_bn2 + residual add + ReLU fused in the pass-2 kernel
    return conv_bn_act(z, p["w2"], p["g2"], p["b2"], sc,
                       stride=1, padding=1, relu=True)


_STAGE_STRIDES = {"block1": 1, "block2": 2, "block3": 2, "block4": 2}


def resnet34_forward(x_nchw, params):
    x = jnp.transpose(x_nchw, (0, 2, 3, 1)).astype(jnp.float32)  # NHWC
    p0 = params["block0"]
    x = conv_bn_act(x, p0["w"], p0["g"], p0["b"], None,
                    stride=2, padding=3, relu=True)
    # MaxPool2d(kernel=3, padding=1, stride=2) -- lax glue
    x = lax.reduce_window(x, -jnp.inf, lax.max, (1, 3, 3, 1), (1, 2, 2, 1),
                          ((0, 0), (1, 1), (1, 1), (0, 0)))
    for stage in ("block1", "block2", "block3", "block4"):
        for i, bp in enumerate(params[stage]):
            stride = _STAGE_STRIDES[stage] if i == 0 else 1
            x = _basic_block_fwd(x, bp, stride, "ws" in bp)
    feat = jnp.mean(x, axis=(1, 2))                              # (N, 512)
    return linear_pallas(feat, jnp.transpose(params["logit"]["w"]),
                         params["logit"]["b"])


# ----------------------------------------------------------------------------
# parameter init
# ----------------------------------------------------------------------------
def _init_conv_bn(key, cin, cout, ksize):
    kw, kg, kb = jax.random.split(key, 3)
    w = 0.1 * jax.random.normal(kw, (cout, cin, ksize, ksize), jnp.float32)
    g = 1.0 + 0.1 * jax.random.normal(kg, (cout,), jnp.float32)
    b = 0.1 * jax.random.normal(kb, (cout,), jnp.float32)
    return w, g, b


def _init_basic_block(key, cin, ch, cout, is_shortcut):
    k1, k2, k3 = jax.random.split(key, 3)
    w1, g1, b1 = _init_conv_bn(k1, cin, ch, 3)
    w2, g2, b2 = _init_conv_bn(k2, ch, cout, 3)
    p = {"w1": w1, "g1": g1, "b1": b1, "w2": w2, "g2": g2, "b2": b2}
    if is_shortcut:
        ws, gs, bs = _init_conv_bn(k3, cin, cout, 1)
        p.update({"ws": ws, "gs": gs, "bs": bs})
    return p


def init_resnet34_params(key, num_class=10):
    keys = jax.random.split(key, 6)
    w0, g0, b0 = _init_conv_bn(keys[0], 3, 64, 7)
    params = {"block0": {"w": w0, "g": g0, "b": b0}}
    cfg = [("block1", 64, 64, 64, False, 3),
           ("block2", 64, 128, 128, True, 4),
           ("block3", 128, 256, 256, True, 6),
           ("block4", 256, 512, 512, True, 3)]
    for idx, (name, cin, ch, cout, sc, nblk) in enumerate(cfg):
        bkeys = jax.random.split(keys[idx + 1], nblk)
        blocks = []
        for i in range(nblk):
            in_c = cin if i == 0 else cout
            blocks.append(_init_basic_block(bkeys[i], in_c, ch, cout,
                                            sc and i == 0))
        params[name] = blocks
    kl1, kl2 = jax.random.split(keys[5], 2)
    params["logit"] = {
        "w": 0.05 * jax.random.normal(kl1, (num_class, 512), jnp.float32),
        "b": 0.05 * jax.random.normal(kl2, (num_class,), jnp.float32),
    }
    return params


# ----------------------------------------------------------------------------
# pure-JAX float32 reference (PyTorch semantics) for validation
# ----------------------------------------------------------------------------
def _ref_conv_bn(x, w, gamma, beta, stride, padding):
    y = lax.conv_general_dilated(
        x.astype(jnp.float32), w.astype(jnp.float32), (stride, stride),
        ((padding, padding), (padding, padding)),
        dimension_numbers=("NCHW", "OIHW", "NCHW"))
    mean = jnp.mean(y, axis=(0, 2, 3), keepdims=True)
    var = jnp.mean((y - mean) ** 2, axis=(0, 2, 3), keepdims=True)
    return ((y - mean) * lax.rsqrt(var + EPS) * gamma.reshape(1, -1, 1, 1)
            + beta.reshape(1, -1, 1, 1))


def _ref_resnet34(x, params):
    p0 = params["block0"]
    x = jax.nn.relu(_ref_conv_bn(x, p0["w"], p0["g"], p0["b"], 2, 3))
    x = lax.reduce_window(x, -jnp.inf, lax.max, (1, 1, 3, 3), (1, 1, 2, 2),
                          ((0, 0), (0, 0), (1, 1), (1, 1)))
    for stage in ("block1", "block2", "block3", "block4"):
        for i, bp in enumerate(params[stage]):
            stride = _STAGE_STRIDES[stage] if i == 0 else 1
            z = jax.nn.relu(_ref_conv_bn(x, bp["w1"], bp["g1"], bp["b1"],
                                         stride, 1))
            z = _ref_conv_bn(z, bp["w2"], bp["g2"], bp["b2"], 1, 1)
            if "ws" in bp:
                x = _ref_conv_bn(x, bp["ws"], bp["gs"], bp["bs"], stride, 0)
            x = jax.nn.relu(z + x)
    feat = jnp.mean(x, axis=(2, 3))
    return feat @ params["logit"]["w"].T + params["logit"]["b"]


# ----------------------------------------------------------------------------
if __name__ == "__main__":
    key = jax.random.PRNGKey(0)
    k_in, k_p, k_cb = jax.random.split(key, 3)

    # ---- 1) unit check: single ConvBn2d vs float32 reference ---------------
    N, Cin, H, W, Cout = 2, 4, 16, 16, 8
    kx, kw, kg, kb = jax.random.split(k_cb, 4)
    x_s = jax.random.normal(kx, (N, Cin, H, W), jnp.float32)
    w_s = 0.1 * jax.random.normal(kw, (Cout, Cin, 3, 3), jnp.float32)
    g_s = 1.0 + 0.1 * jax.random.normal(kg, (Cout,), jnp.float32)
    b_s = 0.1 * jax.random.normal(kb, (Cout,), jnp.float32)

    out_s = conv_bn_act(jnp.transpose(x_s, (0, 2, 3, 1)), w_s, g_s, b_s, None,
                        stride=1, padding=1, relu=False)
    out_s = jnp.transpose(out_s, (0, 3, 1, 2))
    out_s = jax.block_until_ready(out_s)
    ref_s = _ref_conv_bn(x_s, w_s, g_s, b_s, 1, 1)
    assert out_s.shape == (N, Cout, H, W), out_s.shape
    max_err = float(jnp.max(jnp.abs(out_s - ref_s)))
    assert max_err < 5e-2, f"ConvBn2d mismatch, max abs err {max_err}"

    # ---- 2) full ResNet34 forward -------------------------------------------
    num_class = 10
    params = init_resnet34_params(k_p, num_class=num_class)
    x = jax.random.normal(k_in, (2, 3, 64, 64), jnp.float32)

    logits = resnet34_forward(x, params)
    logits = jax.block_until_ready(logits)
    assert logits.shape == (2, num_class), logits.shape
    assert bool(jnp.all(jnp.isfinite(logits)))

    ref_logits = _ref_resnet34(x, params)
    rel = float(jnp.linalg.norm(logits - ref_logits)
                / (jnp.linalg.norm(ref_logits) + 1e-6))
    assert rel < 0.3, f"ResNet34 logits relative error {rel}"

    print("KERNEL_OK")
</pallas_src>

<mosaic_0001>
module attributes {stable_mosaic.version = 11 : i64} {
  func.func @_matmul_stats_kernel(%arg0: i32, %arg1: i32, %arg2: memref<512x128xbf16, #tpu.memory_space<vmem>>, %arg3: memref<128x128xbf16, #tpu.memory_space<vmem>>, %arg4: memref<512x128xf32, #tpu.memory_space<vmem>>, %arg5: memref<8x128xf32, #tpu.memory_space<vmem>>, %arg6: memref<8x128xf32, #tpu.memory_space<vmem>>, %arg7: memref<512x128xf32, #tpu.memory_space<vmem>>) attributes {dimension_semantics = [#tpu.dimension_semantics<parallel>, #tpu.dimension_semantics<arbitrary>], iteration_bounds = array<i64: 1, 1>, scalar_prefetch = 0 : i64, scratch_operands = 1 : i64, tpu.core_type = #tpu.core_type<tc>, window_params = [{transform_indices = @transform_0, window_bounds = array<i64: 512, 128>}, {transform_indices = @transform_1, window_bounds = array<i64: 128, 128>}, {transform_indices = @transform_2, window_bounds = array<i64: 512, 128>}, {transform_indices = @transform_3, window_bounds = array<i64: 8, 128>}, {transform_indices = @transform_4, window_bounds = array<i64: 8, 128>}]} {
    %c0_i32 = arith.constant 0 : i32
    %0 = arith.cmpi eq, %arg1, %c0_i32 : i32
    %1 = arith.extui %0 : i1 to i32
    %c0_i32_0 = arith.constant 0 : i32
    %2 = arith.cmpi ne, %1, %c0_i32_0 : i32
    scf.if %2 {
      %cst_10 = arith.constant 0.000000e+00 : f32
      %12 = vector.broadcast %cst_10 : f32 to vector<512x128xf32>
      %c0_11 = arith.constant 0 : index
      %c0_12 = arith.constant 0 : index
      %13 = vector.load %arg7[%c0_11, %c0_12] : memref<512x128xf32, #tpu.memory_space<vmem>>, vector<512x128xf32>
      tpu.vector_store %arg7[%c0_11, %c0_12], %12 {strides = array<i32>} : memref<512x128xf32, #tpu.memory_space<vmem>>, vector<512x128xf32>,
    } else {
    }
    %c0 = arith.constant 0 : index
    %c0_1 = arith.constant 0 : index
    %3 = vector.load %arg7[%c0, %c0_1] : memref<512x128xf32, #tpu.memory_space<vmem>>, vector<512x128xf32>
    %c0_2 = arith.constant 0 : index
    %c0_3 = arith.constant 0 : index
    %4 = vector.load %arg2[%c0_2, %c0_3] : memref<512x128xbf16, #tpu.memory_space<vmem>>, vector<512x128xbf16>
    %c0_4 = arith.constant 0 : index
    %c0_5 = arith.constant 0 : index
    %5 = vector.load %arg3[%c0_4, %c0_5] : memref<128x128xbf16, #tpu.memory_space<vmem>>, vector<128x128xbf16>
    %cst = arith.constant dense<0.000000e+00> : vector<512x128xf32>
    %6 = tpu.matmul %4, %5, %cst {dimension_numbers = #tpu.dot_dimension_numbers<[1], [0], [0], [1], [0, 0, 1, 1], [], []>} : vector<512x128xbf16>, vector<128x128xbf16>, vector<512x128xf32> -> vector<512x128xf32>
    %7 = arith.addf %3, %6 : vector<512x128xf32>
    %c0_6 = arith.constant 0 : index
    %c0_7 = arith.constant 0 : index
    %8 = vector.load %arg7[%c0_6, %c0_7] : memref<512x128xf32, #tpu.memory_space<vmem>>, vector<512x128xf32>
    tpu.vector_store %arg7[%c0_6, %c0_7], %7 {strides = array<i32>} : memref<512x128xf32, #tpu.memory_space<vmem>>, vector<512x128xf32>,
    %c0_i32_8 = arith.constant 0 : i32
    %9 = arith.cmpi eq, %arg1, %c0_i32_8 : i32
    %10 = arith.extui %9 : i1 to i32
    %c0_i32_9 = arith.constant 0 : i32
    %11 = arith.cmpi ne, %10, %c0_i32_9 : i32
    scf.if %11 {
      %c0_10 = arith.constant 0 : index
      %c0_11 = arith.constant 0 : index
      %12 = vector.load %arg7[%c0_10, %c0_11] : memref<512x128xf32, #tpu.memory_space<vmem>>, vector<512x128xf32>
      %c0_12 = arith.constant 0 : index
      %c0_13 = arith.constant 0 : index
      %13 = vector.load %arg4[%c0_12, %c0_13] : memref<512x128xf32, #tpu.memory_space<vmem>>, vector<512x128xf32>
      tpu.vector_store %arg4[%c0_12, %c0_13], %12 {strides = array<i32>} : memref<512x128xf32, #tpu.memory_space<vmem>>, vector<512x128xf32>,
      %cst_14 = arith.constant dense<0.000000e+00> : vector<128xf32>
      %14 = vector.multi_reduction <add>, %12, %cst_14 [0] : vector<512x128xf32> to vector<128xf32>
      %15 = vector.shape_cast %14 : vector<128xf32> to vector<1x128xf32>
      %16 = arith.mulf %12, %12 : vector<512x128xf32>
      %cst_15 = arith.constant dense<0.000000e+00> : vector<128xf32>
      %17 = vector.multi_reduction <add>, %16, %cst_15 [0] : vector<512x128xf32> to vector<128xf32>
      %18 = vector.shape_cast %17 : vector<128xf32> to vector<1x128xf32>
      %19 = vector.shape_cast %15 : vector<1x128xf32> to vector<1x128xf32>
      %20 = vector.broadcast %19 : vector<1x128xf32> to vector<8x128xf32>
      %c0_16 = arith.constant 0 : index
      %c0_17 = arith.constant 0 : index
      %21 = vector.load %arg5[%c0_16, %c0_17] : memref<8x128xf32, #tpu.memory_space<vmem>>, vector<8x128xf32>
      tpu.vector_store %arg5[%c0_16, %c0_17], %20 {strides = array<i32>} : memref<8x128xf32, #tpu.memory_space<vmem>>, vector<8x128xf32>,
      %22 = vector.shape_cast %18 : vector<1x128xf32> to vector<1x128xf32>
      %23 = vector.broadcast %22 : vector<1x128xf32> to vector<8x128xf32>
      %c0_18 = arith.constant 0 : index
      %c0_19 = arith.constant 0 : index
      %24 = vector.load %arg6[%c0_18, %c0_19] : memref<8x128xf32, #tpu.memory_space<vmem>>, vector<8x128xf32>
      tpu.vector_store %arg6[%c0_18, %c0_19], %23 {strides = array<i32>} : memref<8x128xf32, #tpu.memory_space<vmem>>, vector<8x128xf32>,
    } else {
    }
    return
  }
  func.func @transform_0(%arg0: i32, %arg1: i32) -> (i32, i32) {
    %c0_i32 = arith.constant 0 : i32
    return %arg0, %arg1 : i32, i32
  }
  func.func @transform_1(%arg0: i32, %arg1: i32) -> (i32, i32) {
    %c0_i32 = arith.constant 0 : i32
    %c0_i32_0 = arith.constant 0 : i32
    return %arg1, %c0_i32 : i32, i32
  }
  func.func @transform_2(%arg0: i32, %arg1: i32) -> (i32, i32) {
    %c0_i32 = arith.constant 0 : i32
    %c0_i32_0 = arith.constant 0 : i32
    return %arg0, %c0_i32 : i32, i32
  }
  func.func @transform_3(%arg0: i32, %arg1: i32) -> (i32, i32) {
    %c0_i32 = arith.constant 0 : i32
    %c0_i32_0 = arith.constant 0 : i32
    return %arg0, %c0_i32 : i32, i32
  }
  func.func @transform_4(%arg0: i32, %arg1: i32) -> (i32, i32) {
    %c0_i32 = arith.constant 0 : i32
    %c0_i32_0 = arith.constant 0 : i32
    return %arg0, %c0_i32 : i32, i32
  }
}

module attributes {stable_mosaic.version = 11 : i64} {
  func.func @_bn_act_kernel(%arg0: i32, %arg1: memref<512x128xf32, #tpu.memory_space<vmem>>, %arg2: memref<1x128xf32, #tpu.memory_space<vmem>>, %arg3: memref<1x128xf32, #tpu.memory_space<vmem>>, %arg4: memref<512x128xf32, #tpu.memory_space<vmem>>) attributes {dimension_semantics = [#tpu.dimension_semantics<parallel>], iteration_bounds = array<i64: 1>, scalar_prefetch = 0 : i64, scratch_operands = 0 : i64, tpu.core_type = #tpu.core_type<tc>, window_params = [{transform_indices = @transform_0, window_bounds = array<i64: 512, 128>}, {pipeline_mode = #tpu.pipeline_mode<synchronous>, transform_indices = @transform_1, window_bounds = array<i64: 1, 128>}, {pipeline_mode = #tpu.pipeline_mode<synchronous>, transform_indices = @transform_2, window_bounds = array<i64: 1, 128>}, {transform_indices = @transform_3, window_bounds = array<i64: 512, 128>}]} {
    %c0 = arith.constant 0 : index
    %c0_0 = arith.constant 0 : index
    %0 = vector.load %arg1[%c0, %c0_0] : memref<512x128xf32, #tpu.memory_space<vmem>>, vector<512x128xf32>
    %c0_1 = arith.constant 0 : index
    %c0_2 = arith.constant 0 : index
    %1 = vector.load %arg2[%c0_1, %c0_2] : memref<1x128xf32, #tpu.memory_space<vmem>>, vector<1x128xf32>
    %2 = vector.broadcast %1 : vector<1x128xf32> to vector<512x128xf32>
    %3 = arith.mulf %0, %2 : vector<512x128xf32>
    %c0_3 = arith.constant 0 : index
    %c0_4 = arith.constant 0 : index
    %4 = vector.load %arg3[%c0_3, %c0_4] : memref<1x128xf32, #tpu.memory_space<vmem>>, vector<1x128xf32>
    %5 = vector.broadcast %4 : vector<1x128xf32> to vector<512x128xf32>
    %6 = arith.addf %3, %5 : vector<512x128xf32>
    %c0_5 = arith.constant 0 : index
    %c0_6 = arith.constant 0 : index
    %7 = vector.load %arg4[%c0_5, %c0_6] : memref<512x128xf32, #tpu.memory_space<vmem>>, vector<512x128xf32>
    tpu.vector_store %arg4[%c0_5, %c0_6], %6 {strides = array<i32>} : memref<512x128xf32, #tpu.memory_space<vmem>>, vector<512x128xf32>,
    return
  }
  func.func @transform_0(%arg0: i32) -> (i32, i32) {
    %c0_i32 = arith.constant 0 : i32
    %c0_i32_0 = arith.constant 0 : i32
    return %arg0, %c0_i32 : i32, i32
  }
  func.func @transform_1(%arg0: i32) -> (i32, i32) {
    %c0_i32 = arith.constant 0 : i32
    %c0_i32_0 = arith.constant 0 : i32
    %c0_i32_1 = arith.constant 0 : i32
    return %c0_i32, %c0_i32_0 : i32, i32
  }
  func.func @transform_2(%arg0: i32) -> (i32, i32) {
    %c0_i32 = arith.constant 0 : i32
    %c0_i32_0 = arith.constant 0 : i32
    %c0_i32_1 = arith.constant 0 : i32
    return %c0_i32, %c0_i32_0 : i32, i32
  }
  func.func @transform_3(%arg0: i32) -> (i32, i32) {
    %c0_i32 = arith.constant 0 : i32
    %c0_i32_0 = arith.constant 0 : i32
    return %arg0, %c0_i32 : i32, i32
  }
}

</mosaic_0001>

<bundles_post_ra>
// kernel: conv_bn_act.3
= control target key start
LH: loop header
LB: loop body
LE: loop exit
PB: predicated region body
PF: predicated region fallthrough
CT: control target
= control target key end

     0   :  { %s832_s0 = inlined_call_operand.vmem [shape: f32[512,128], index: 0, kind: input, shape index: {}]   ;;  %s833_s1 = inlined_call_operand.vmem [shape: f32[1,128], index: 1, kind: input, shape index: {}]   ;;  %s834_s2 = inlined_call_operand.vmem [shape: f32[1,128], index: 2, kind: input, shape index: {}]   ;;  %s835_s3 = inlined_call_operand.vmem [shape: f32[512,128], index: 3, kind: output, shape index: {}]  }
   0x1   :  { %v14_v0 = vld [vmem:[%s832_s0] sm:$0xff]  ;;  %v15_v4 = vld [vmem:[%s832_s0 + $0x8] sm:$0xff]  ;;  %v16_v5 = vld [vmem:[%s832_s0 + $0x10] sm:$0xff] }
   0x2   :  { %v316_v1 = vld [vmem:[%s833_s1] ss:$0 sm:$0xff]  ;;  %v17_v6 = vld [vmem:[%s832_s0 + $0x18] sm:$0xff]  ;;  %v19_v11 = vld [vmem:[%s832_s0 + $0x28] sm:$0xff] }
   0x3   :  { %v321_v2 = vld [vmem:[%s834_s2] ss:$0 sm:$0xff]  ;;  %v85_v3 = vmul.f32 %v316_v1, %v14_v0  ;;  %v86_v7 = vmul.f32 %v316_v1, %v15_v4  ;;  %v87_v8 = vmul.f32 %v316_v1, %v16_v5  ;;  %v88_v9 = vmul.f32 %v316_v1, %v17_v6  ;;  %v20_v12 = vld [vmem:[%s832_s0 + $0x30] sm:$0xff]  ;;  %v21_v17 = vld [vmem:[%s832_s0 + $0x38] sm:$0xff] }
   0x4   :  { %v18_v10 = vld [vmem:[%s832_s0 + $0x20] sm:$0xff]  ;;  %v90_v15 = vmul.f32 %v316_v1, %v19_v11  ;;  %v91_v16 = vmul.f32 %v316_v1, %v20_v12  ;;  %v23_v19 = vld [vmem:[%s832_s0 + $0x48] sm:$0xff]  ;;  %v92_v23 = vmul.f32 %v316_v1, %v21_v17  ;;  %v24_v24 = vld [vmem:[%s832_s0 + $0x50] sm:$0xff] }
   0x5   :  { %v156_v13 = vadd.f32 %v321_v2, %v85_v3  ;;  %v89_v14 = vmul.f32 %v316_v1, %v18_v10  ;;  %v22_v18 = vld [vmem:[%s832_s0 + $0x40] sm:$0xff]  ;;  %v157_v20 = vadd.f32 %v321_v2, %v86_v7  ;;  %v158_v21 = vadd.f32 %v321_v2, %v87_v8  ;;  %v25_v25 = vld [vmem:[%s832_s0 + $0x58] sm:$0xff]  ;;  %v27_v31 = vld [vmem:[%s832_s0 + $0x68] sm:$0xff] }
   0x6   :  { %v159_v22 = vadd.f32 %v321_v2, %v88_v9  ;;  %v26_v26 = vld [vmem:[%s832_s0 + $0x60] sm:$0xff]  ;;  %v161_v28 = vadd.f32 %v321_v2, %v90_v15  ;;  %v162_v29 = vadd.f32 %v321_v2, %v91_v16  ;;  %v93_v30 = vmul.f32 %v316_v1, %v22_v18  ;;  %v28_v32 = vld [vmem:[%s832_s0 + $0x70] sm:$0xff]  ;;  %v29_v33 = vld [vmem:[%s832_s0 + $0x78] sm:$0xff] }
   0x7   :  { %220 = vst [vmem:[%s835_s3] sm:$0xff] %v156_v13  ;;  %v160_v27 = vadd.f32 %v321_v2, %v89_v14  ;;  %221 = vst [vmem:[%s835_s3 + $0x8] sm:$0xff] %v157_v20  ;;  %v163_v34 = vadd.f32 %v321_v2, %v92_v23  ;;  %v94_v35 = vmul.f32 %v316_v1, %v23_v19  ;;  %v30_v38 = vld [vmem:[%s832_s0 + $0x80] sm:$0xff]  ;;  %v31_v43 = vld [vmem:[%s832_s0 + $0x88] sm:$0xff] }
   0x8   :  { %222 = vst [vmem:[%s835_s3 + $0x10] sm:$0xff] %v158_v21  ;;  %223 = vst [vmem:[%s835_s3 + $0x18] sm:$0xff] %v159_v22  ;;  %v95_v36 = vmul.f32 %v316_v1, %v24_v24  ;;  %v96_v37 = vmul.f32 %v316_v1, %v25_v25  ;;  %v164_v39 = vadd.f32 %v321_v2, %v93_v30  ;;  %v32_v44 = vld [vmem:[%s832_s0 + $0x90] sm:$0xff]  ;;  %v33_v45 = vld [vmem:[%s832_s0 + $0x98] sm:$0xff] }
   0x9   :  { %224 = vst [vmem:[%s835_s3 + $0x20] sm:$0xff] %v160_v27  ;;  %225 = vst [vmem:[%s835_s3 + $0x28] sm:$0xff] %v161_v28  ;;  %v97_v40 = vmul.f32 %v316_v1, %v26_v26  ;;  %v98_v41 = vmul.f32 %v316_v1, %v27_v31  ;;  %v99_v42 = vmul.f32 %v316_v1, %v28_v32  ;;  %v34_v50 = vld [vmem:[%s832_s0 + $0xa0] sm:$0xff]  ;;  %v35_v51 = vld [vmem:[%s832_s0 + $0xa8] sm:$0xff] }
   0xa   :  { %226 = vst [vmem:[%s835_s3 + $0x30] sm:$0xff] %v162_v29  ;;  %227 = vst [vmem:[%s835_s3 + $0x38] sm:$0xff] %v163_v34  ;;  %v165_v46 = vadd.f32 %v321_v2, %v94_v35  ;;  %v166_v47 = vadd.f32 %v321_v2, %v95_v36  ;;  %v167_v48 = vadd.f32 %v321_v2, %v96_v37  ;;  %v36_v52 = vld [vmem:[%s832_s0 + $0xb0] sm:$0xff]  ;;  %v37_v57 = vld [vmem:[%s832_s0 + $0xb8] sm:$0xff] }
   0xb   :  { %v100_v49 = vmul.f32 %v316_v1, %v29_v33  ;;  %228 = vst [vmem:[%s835_s3 + $0x40] sm:$0xff] %v164_v39  ;;  %v168_v53 = vadd.f32 %v321_v2, %v97_v40  ;;  %v169_v54 = vadd.f32 %v321_v2, %v98_v41  ;;  %v170_v55 = vadd.f32 %v321_v2, %v99_v42  ;;  %v38_v62 = vld [vmem:[%s832_s0 + $0xc0] sm:$0xff]  ;;  %v39_v5 = vld [vmem:[%s832_s0 + $0xc8] sm:$0xff]  ;;  %v40_v6 = vld [vmem:[%s832_s0 + $0xd0] sm:$0xff] }
   0xc   :  { %v101_v56 = vmul.f32 %v316_v1, %v30_v38  ;;  %229 = vst [vmem:[%s835_s3 + $0x48] sm:$0xff] %v165_v46  ;;  %230 = vst [vmem:[%s835_s3 + $0x50] sm:$0xff] %v166_v47  ;;  %v102_v59 = vmul.f32 %v316_v1, %v31_v43  ;;  %v103_v60 = vmul.f32 %v316_v1, %v32_v44  ;;  %v41_v7 = vld [vmem:[%s832_s0 + $0xd8] sm:$0xff]  ;;  %v42_v12 = vld [vmem:[%s832_s0 + $0xe0] sm:$0xff] }
   0xd   :  { %231 = vst [vmem:[%s835_s3 + $0x58] sm:$0xff] %v167_v48  ;;  %v171_v58 = vadd.f32 %v321_v2, %v100_v49  ;;  %v104_v61 = vmul.f32 %v316_v1, %v33_v45  ;;  %232 = vst [vmem:[%s835_s3 + $0x60] sm:$0xff] %v168_v53  ;;  %v105_v0 = vmul.f32 %v316_v1, %v34_v50  ;;  %v43_v13 = vld [vmem:[%s832_s0 + $0xe8] sm:$0xff]  ;;  %v44_v14 = vld [vmem:[%s832_s0 + $0xf0] sm:$0xff] }
   0xe   :  { %233 = vst [vmem:[%s835_s3 + $0x68] sm:$0xff] %v169_v54  ;;  %234 = vst [vmem:[%s835_s3 + $0x70] sm:$0xff] %v170_v55  ;;  %v172_v63 = vadd.f32 %v321_v2, %v101_v56  ;;  %v106_v3 = vmul.f32 %v316_v1, %v35_v51  ;;  %v107_v4 = vmul.f32 %v316_v1, %v36_v52  ;;  %v45_v19 = vld [vmem:[%s832_s0 + $0xf8] sm:$0xff]  ;;  %v46_v24 = vld [vmem:[%s832_s0 + $0x100] sm:$0xff] }
   0xf   :  { %235 = vst [vmem:[%s835_s3 + $0x78] sm:$0xff] %v171_v58  ;;  %v173_v8 = vadd.f32 %v321_v2, %v102_v59  ;;  %v174_v9 = vadd.f32 %v321_v2, %v103_v60  ;;  %v175_v10 = vadd.f32 %v321_v2, %v104_v61  ;;  %v108_v11 = vmul.f32 %v316_v1, %v37_v57  ;;  %v47_v29 = vld [vmem:[%s832_s0 + $0x108] sm:$0xff]  ;;  %v48_v30 = vld [vmem:[%s832_s0 + $0x110] sm:$0xff]  ;;  %v49_v31 = vld [vmem:[%s832_s0 + $0x118] sm:$0xff] }
  0x10   :  { %236 = vst [vmem:[%s835_s3 + $0x80] sm:$0xff] %v172_v63  ;;  %v176_v15 = vadd.f32 %v321_v2, %v105_v0  ;;  %v177_v16 = vadd.f32 %v321_v2, %v106_v3  ;;  %v178_v17 = vadd.f32 %v321_v2, %v107_v4  ;;  %v109_v18 = vmul.f32 %v316_v1, %v38_v62  ;;  %v50_v36 = vld [vmem:[%s832_s0 + $0x120] sm:$0xff]  ;;  %v51_v37 = vld [vmem:[%s832_s0 + $0x128] sm:$0xff]  ;;  %v52_v38 = vld [vmem:[%s832_s0 + $0x130] sm:$0xff] }
  0x11   :  { %237 = vst [vmem:[%s835_s3 + $0x88] sm:$0xff] %v173_v8  ;;  %238 = vst [vmem:[%s835_s3 + $0x90] sm:$0xff] %v174_v9  ;;  %v179_v20 = vadd.f32 %v321_v2, %v108_v11  ;;  %v110_v21 = vmul.f32 %v316_v1, %v39_v5  ;;  %v111_v22 = vmul.f32 %v316_v1, %v40_v6  ;;  %v53_v43 = vld [vmem:[%s832_s0 + $0x138] sm:$0xff]  ;;  %v54_v48 = vld [vmem:[%s832_s0 + $0x140] sm:$0xff] }
  0x12   :  { %239 = vst [vmem:[%s835_s3 + $0x98] sm:$0xff] %v175_v10  ;;  %v112_v23 = vmul.f32 %v316_v1, %v41_v7  ;;  %240 = vst [vmem:[%s835_s3 + $0xa0] sm:$0xff] %v176_v15  ;;  %v180_v25 = vadd.f32 %v321_v2, %v109_v18  ;;  %v113_v26 = vmul.f32 %v316_v1, %v42_v12  ;;  %v55_v53 = vld [vmem:[%s832_s0 + $0x148] sm:$0xff]  ;;  %v56_v54 = vld [vmem:[%s832_s0 + $0x150] sm:$0xff] }
  0x13   :  { %241 = vst [vmem:[%s835_s3 + $0xa8] sm:$0xff] %v177_v16  ;;  %242 = vst [vmem:[%s835_s3 + $0xb0] sm:$0xff] %v178_v17  ;;  %v114_v27 = vmul.f32 %v316_v1, %v43_v13  ;;  %v115_v28 = vmul.f32 %v316_v1, %v44_v14  ;;  %v181_v32 = vadd.f32 %v321_v2, %v110_v21  ;;  %v57_v55 = vld [vmem:[%s832_s0 + $0x158] sm:$0xff]  ;;  %v58_v60 = vld [vmem:[%s832_s0 + $0x160] sm:$0xff] }
  0x14   :  { %243 = vst [vmem:[%s835_s3 + $0xb8] sm:$0xff] %v179_v20  ;;  %v182_v33 = vadd.f32 %v321_v2, %v111_v22  ;;  %v183_v34 = vadd.f32 %v321_v2, %v112_v23  ;;  %v116_v35 = vmul.f32 %v316_v1, %v45_v19  ;;  %244 = vst [vmem:[%s835_s3 + $0xc0] sm:$0xff] %v180_v25  ;;  %v59_v61 = vld [vmem:[%s832_s0 + $0x168] sm:$0xff]  ;;  %v60_v62 = vld [vmem:[%s832_s0 + $0x170] sm:$0xff] }
  0x15   :  { %v184_v39 = vadd.f32 %v321_v2, %v113_v26  ;;  %v185_v40 = vadd.f32 %v321_v2, %v114_v27  ;;  %v186_v41 = vadd.f32 %v321_v2, %v115_v28  ;;  %v117_v42 = vmul.f32 %v316_v1, %v46_v24  ;;  %245 = vst [vmem:[%s835_s3 + $0xc8] sm:$0xff] %v181_v32  ;;  %v61_v5 = vld [vmem:[%s832_s0 + $0x178] sm:$0xff]  ;;  %v62_v10 = vld [vmem:[%s832_s0 + $0x180] sm:$0xff]  ;;  %v63_v15 = vld [vmem:[%s832_s0 + $0x188] sm:$0xff] }
  0x16   :  { %246 = vst [vmem:[%s835_s3 + $0xd0] sm:$0xff] %v182_v33  ;;  %247 = vst [vmem:[%s835_s3 + $0xd8] sm:$0xff] %v183_v34  ;;  %v187_v44 = vadd.f32 %v321_v2, %v116_v35  ;;  %v118_v45 = vmul.f32 %v316_v1, %v47_v29  ;;  %v119_v46 = vmul.f32 %v316_v1, %v48_v30  ;;  %v64_v16 = vld [vmem:[%s832_s0 + $0x190] sm:$0xff]  ;;  %v65_v17 = vld [vmem:[%s832_s0 + $0x198] sm:$0xff] }
  0x17   :  { %v120_v47 = vmul.f32 %v316_v1, %v49_v31  ;;  %248 = vst [vmem:[%s835_s3 + $0xe0] sm:$0xff] %v184_v39  ;;  %249 = vst [vmem:[%s835_s3 + $0xe8] sm:$0xff] %v185_v40  ;;  %v188_v49 = vadd.f32 %v321_v2, %v117_v42  ;;  %v121_v50 = vmul.f32 %v316_v1, %v50_v36  ;;  %v66_v22 = vld [vmem:[%s832_s0 + $0x1a0] sm:$0xff]  ;;  %v67_v23 = vld [vmem:[%s832_s0 + $0x1a8] sm:$0xff] }
  0x18   :  { %250 = vst [vmem:[%s835_s3 + $0xf0] sm:$0xff] %v186_v41  ;;  %v122_v51 = vmul.f32 %v316_v1, %v51_v37  ;;  %v123_v52 = vmul.f32 %v316_v1, %v52_v38  ;;  %251 = vst [vmem:[%s835_s3 + $0xf8] sm:$0xff] %v187_v44  ;;  %v189_v56 = vadd.f32 %v321_v2, %v118_v45  ;;  %v68_v24 = vld [vmem:[%s832_s0 + $0x1b0] sm:$0xff]  ;;  %v69_v29 = vld [vmem:[%s832_s0 + $0x1b8] sm:$0xff] }
  0x19   :  { %v190_v57 = vadd.f32 %v321_v2, %v119_v46  ;;  %v191_v58 = vadd.f32 %v321_v2, %v120_v47  ;;  %v124_v59 = vmul.f32 %v316_v1, %v53_v43  ;;  %252 = vst [vmem:[%s835_s3 + $0x100] sm:$0xff] %v188_v49  ;;  %v192_v63 = vadd.f32 %v321_v2, %v121_v50  ;;  %v70_v34 = vld [vmem:[%s832_s0 + $0x1c0] sm:$0xff]  ;;  %v71_v39 = vld [vmem:[%s832_s0 + $0x1c8] sm:$0xff]  ;;  %v72_v40 = vld [vmem:[%s832_s0 + $0x1d0] sm:$0xff] }
  0x1a   :  { %v193_v0 = vadd.f32 %v321_v2, %v122_v51  ;;  %v194_v3 = vadd.f32 %v321_v2, %v123_v52  ;;  %v125_v4 = vmul.f32 %v316_v1, %v54_v48  ;;  %253 = vst [vmem:[%s835_s3 + $0x108] sm:$0xff] %v189_v56  ;;  %v126_v7 = vmul.f32 %v316_v1, %v55_v53  ;;  %v73_v41 = vld [vmem:[%s832_s0 + $0x1d8] sm:$0xff]  ;;  %v74_v46 = vld [vmem:[%s832_s0 + $0x1e0] sm:$0xff]  ;;  %v75_v47 = vld [vmem:[%s832_s0 + $0x1e8] sm:$0xff] }
  0x1b   :  { %254 = vst [vmem:[%s835_s3 + $0x110] sm:$0xff] %v190_v57  ;;  %255 = vst [vmem:[%s835_s3 + $0x118] sm:$0xff] %v191_v58  ;;  %v195_v6 = vadd.f32 %v321_v2, %v124_v59  ;;  %v127_v8 = vmul.f32 %v316_v1, %v56_v54  ;;  %v128_v9 = vmul.f32 %v316_v1, %v57_v55  ;;  %v76_v48 = vld [vmem:[%s832_s0 + $0x1f0] sm:$0xff]  ;;  %v77_v53 = vld [vmem:[%s832_s0 + $0x1f8] sm:$0xff] }
  0x1c   :  { %256 = vst [vmem:[%s835_s3 + $0x120] sm:$0xff] %v192_v63  ;;  %257 = vst [vmem:[%s835_s3 + $0x128] sm:$0xff] %v193_v0  ;;  %v196_v11 = vadd.f32 %v321_v2, %v125_v4  ;;  %v129_v12 = vmul.f32 %v316_v1, %v58_v60  ;;  %v130_v13 = vmul.f32 %v316_v1, %v59_v61 }
  0x1d   :  { %258 = vst [vmem:[%s835_s3 + $0x130] sm:$0xff] %v194_v3  ;;  %v131_v14 = vmul.f32 %v316_v1, %v60_v62  ;;  %259 = vst [vmem:[%s835_s3 + $0x138] sm:$0xff] %v195_v6  ;;  %v197_v18 = vadd.f32 %v321_v2, %v126_v7  ;;  %v198_v19 = vadd.f32 %v321_v2, %v127_v8 }
  0x1e   :  { %v199_v20 = vadd.f32 %v321_v2, %v128_v9  ;;  %v132_v21 = vmul.f32 %v316_v1, %v61_v5  ;;  %260 = vst [vmem:[%s835_s3 + $0x140] sm:$0xff] %v196_v11  ;;  %v200_v25 = vadd.f32 %v321_v2, %v129_v12  ;;  %v201_v26 = vadd.f32 %v321_v2, %v130_v13 }
  0x1f   :  { %v202_v27 = vadd.f32 %v321_v2, %v131_v14  ;;  %v133_v28 = vmul.f32 %v316_v1, %v62_v10  ;;  %261 = vst [vmem:[%s835_s3 + $0x148] sm:$0xff] %v197_v18  ;;  %262 = vst [vmem:[%s835_s3 + $0x150] sm:$0xff] %v198_v19  ;;  %v134_v31 = vmul.f32 %v316_v1, %v63_v15 }
  0x20   :  { %263 = vst [vmem:[%s835_s3 + $0x158] sm:$0xff] %v199_v20  ;;  %v203_v30 = vadd.f32 %v321_v2, %v132_v21  ;;  %v135_v32 = vmul.f32 %v316_v1, %v64_v16  ;;  %v136_v33 = vmul.f32 %v316_v1, %v65_v17  ;;  %264 = vst [vmem:[%s835_s3 + $0x160] sm:$0xff] %v200_v25 }
  0x21   :  { %265 = vst [vmem:[%s835_s3 + $0x168] sm:$0xff] %v201_v26  ;;  %266 = vst [vmem:[%s835_s3 + $0x170] sm:$0xff] %v202_v27  ;;  %v204_v35 = vadd.f32 %v321_v2, %v133_v28  ;;  %v137_v36 = vmul.f32 %v316_v1, %v66_v22  ;;  %v138_v37 = vmul.f32 %v316_v1, %v67_v23 }
  0x22   :  { %v139_v38 = vmul.f32 %v316_v1, %v68_v24  ;;  %267 = vst [vmem:[%s835_s3 + $0x178] sm:$0xff] %v203_v30  ;;  %v205_v42 = vadd.f32 %v321_v2, %v134_v31  ;;  %v206_v43 = vadd.f32 %v321_v2, %v135_v32  ;;  %v207_v44 = vadd.f32 %v321_v2, %v136_v33 }
  0x23   :  { %v140_v45 = vmul.f32 %v316_v1, %v69_v29  ;;  %268 = vst [vmem:[%s835_s3 + $0x180] sm:$0xff] %v204_v35  ;;  %v208_v49 = vadd.f32 %v321_v2, %v137_v36  ;;  %v209_v50 = vadd.f32 %v321_v2, %v138_v37  ;;  %v141_v52 = vmul.f32 %v316_v1, %v70_v34 }
  0x24   :  { %v210_v51 = vadd.f32 %v321_v2, %v139_v38  ;;  %269 = vst [vmem:[%s835_s3 + $0x188] sm:$0xff] %v205_v42  ;;  %270 = vst [vmem:[%s835_s3 + $0x190] sm:$0xff] %v206_v43  ;;  %v142_v55 = vmul.f32 %v316_v1, %v71_v39  ;;  %v143_v56 = vmul.f32 %v316_v1, %v72_v40 }
  0x25   :  { %271 = vst [vmem:[%s835_s3 + $0x198] sm:$0xff] %v207_v44  ;;  %v211_v54 = vadd.f32 %v321_v2, %v140_v45  ;;  %v144_v57 = vmul.f32 %v316_v1, %v73_v41  ;;  %272 = vst [vmem:[%s835_s3 + $0x1a0] sm:$0xff] %v208_v49  ;;  %v212_v58 = vadd.f32 %v321_v2, %v141_v52 }
  0x26   :  { %273 = vst [vmem:[%s835_s3 + $0x1a8] sm:$0xff] %v209_v50  ;;  %274 = vst [vmem:[%s835_s3 + $0x1b0] sm:$0xff] %v210_v51  ;;  %v145_v59 = vmul.f32 %v316_v1, %v74_v46  ;;  %v146_v60 = vmul.f32 %v316_v1, %v75_v47  ;;  %v147_v61 = vmul.f32 %v316_v1, %v76_v48 }
  0x27   :  { %275 = vst [vmem:[%s835_s3 + $0x1b8] sm:$0xff] %v211_v54  ;;  %v213_v62 = vadd.f32 %v321_v2, %v142_v55  ;;  %v214_v63 = vadd.f32 %v321_v2, %v143_v56  ;;  %v215_v0 = vadd.f32 %v321_v2, %v144_v57  ;;  %v148_v3 = vmul.f32 %v316_v1, %v77_v53 }
  0x28   :  { %276 = vst [vmem:[%s835_s3 + $0x1c0] sm:$0xff] %v212_v58  ;;  %v216_v4 = vadd.f32 %v321_v2, %v145_v59  ;;  %v217_v5 = vadd.f32 %v321_v2, %v146_v60  ;;  %v218_v6 = vadd.f32 %v321_v2, %v147_v61 }
  0x29   :  { %277 = vst [vmem:[%s835_s3 + $0x1c8] sm:$0xff] %v213_v62  ;;  %278 = vst [vmem:[%s835_s3 + $0x1d0] sm:$0xff] %v214_v63  ;;  %v219_v1 = vadd.f32 %v321_v2, %v148_v3 }
  0x2a   :  { %279 = vst [vmem:[%s835_s3 + $0x1d8] sm:$0xff] %v215_v0  ;;  %280 = vst [vmem:[%s835_s3 + $0x1e0] sm:$0xff] %v216_v4 }
  0x2b   :  { %281 = vst [vmem:[%s835_s3 + $0x1e8] sm:$0xff] %v217_v5  ;;  %282 = vst [vmem:[%s835_s3 + $0x1f0] sm:$0xff] %v218_v6 }
  0x2c   :  { %283 = vst [vmem:[%s835_s3 + $0x1f8] sm:$0xff] %v219_v1 }

// kernel: conv_bn_act.2
= control target key start
LH: loop header
LB: loop body
LE: loop exit
PB: predicated region body
PF: predicated region fallthrough
CT: control target
= control target key end

     0   :  { %s1982_s1 = inlined_call_operand.vmem [shape: bf16[128,128], index: 1, kind: input, shape index: {}]   ;;  %s1983_s0 = inlined_call_operand.vmem [shape: bf16[512,128], index: 0, kind: input, shape index: {}]   ;;  %s1984_s2 = inlined_call_operand.vmem [shape: f32[512,128], index: 2, kind: output, shape index: {0}]   ;;  %s1985_s3 = inlined_call_operand.vmem [shape: f32[8,128], index: 3, kind: output, shape index: {1}]   ;;  %s1986_s4 = inlined_call_operand.vmem [shape: f32[8,128], index: 4, kind: output, shape index: {2}]  }
   0x1   :  { %v1407_v0 = vld [vmem:[%s1982_s1] sm:$0xff]   ;;  %v1408_v1 = vld [vmem:[%s1982_s1 + $0x8] sm:$0xff]   ;;  %v1409_v2 = vld [vmem:[%s1982_s1 + $0x10] sm:$0xff]  }
   0x2   :  { %1311 = vmatprep.subr.bf16.mxu0 %v1407_v0  ;;  %1391 = vmatprep.subr.bf16.mxu1 %v1407_v0  ;;  %v1410_v3 = vld [vmem:[%s1982_s1 + $0x18] sm:$0xff]   ;;  %v1415_v4 = vld [vmem:[%s1983_s0] sm:$0xff]   ;;  %v1412_v6 = vld [vmem:[%s1982_s1 + $0x28] sm:$0xff]  }
   0x3   :  { %1312 = vmatpush3.bf16.msra.mxu0 %v1407_v0  ;;  %1399 = vmatpush3.bf16.msra.mxu1 %v1407_v0  ;;  %v1411_v5 = vld [vmem:[%s1982_s1 + $0x20] sm:$0xff]   ;;  %v1413_v7 = vld [vmem:[%s1982_s1 + $0x30] sm:$0xff]   ;;  %v1414_v8 = vld [vmem:[%s1982_s1 + $0x38] sm:$0xff]  }
   0x4   :  { %1313 = vmatprep.subr.bf16.mxu0 %v1408_v1  ;;  %1392 = vmatprep.subr.bf16.mxu1 %v1408_v1  ;;  %v1431_v9 = vld [vmem:[%s1983_s0 + $0x80] sm:$0xff]   ;;  %v1416_v10 = vld [vmem:[%s1983_s0 + $0x8] sm:$0xff]   ;;  %v1417_v11 = vld [vmem:[%s1983_s0 + $0x10] sm:$0xff]  }
   0x5   :  { %1327 = vmatprep.mubr.bf16.mxu0 %v1415_v4  ;;  %1359 = vmatprep.mubr.bf16.mxu1 %v1431_v9  ;;  %v1432_v12 = vld [vmem:[%s1983_s0 + $0x88] sm:$0xff]   ;;  %v1433_v13 = vld [vmem:[%s1983_s0 + $0x90] sm:$0xff]   ;;  %v1418_v14 = vld [vmem:[%s1983_s0 + $0x18] sm:$0xff]  }
   0x6   :  { %v1419_v15 = vld [vmem:[%s1983_s0 + $0x20] sm:$0xff]   ;;  %v1434_v16 = vld [vmem:[%s1983_s0 + $0x98] sm:$0xff]   ;;  %v1420_v18 = vld [vmem:[%s1983_s0 + $0x28] sm:$0xff]  }
   0x7   :  { %1314 = vmatpush3.bf16.msra.mxu0 %v1408_v1  ;;  %1400 = vmatpush3.bf16.msra.mxu1 %v1408_v1  ;;  %v1435_v17 = vld [vmem:[%s1983_s0 + $0xa0] sm:$0xff]   ;;  %v1436_v19 = vld [vmem:[%s1983_s0 + $0xa8] sm:$0xff]   ;;  %v1421_v20 = vld [vmem:[%s1983_s0 + $0x30] sm:$0xff]  }
   0x8   :  { %1315 = vmatprep.subr.bf16.mxu0 %v1409_v2  ;;  %1393 = vmatprep.subr.bf16.mxu1 %v1409_v2  ;;  %v1437_v21 = vld [vmem:[%s1983_s0 + $0xb0] sm:$0xff]   ;;  %v1422_v22 = vld [vmem:[%s1983_s0 + $0x38] sm:$0xff]   ;;  %v1423_v24 = vld [vmem:[%s1983_s0 + $0x40] sm:$0xff]  }
   0x9   :  { %v1438_v23 = vld [vmem:[%s1983_s0 + $0xb8] sm:$0xff]   ;;  %v1439_v25 = vld [vmem:[%s1983_s0 + $0xc0] sm:$0xff]   ;;  %v1424_v26 = vld [vmem:[%s1983_s0 + $0x48] sm:$0xff]  }
   0xa   :  { %v1440_v27 = vld [vmem:[%s1983_s0 + $0xc8] sm:$0xff]   ;;  %v1425_v28 = vld [vmem:[%s1983_s0 + $0x50] sm:$0xff]   ;;  %v1426_v30 = vld [vmem:[%s1983_s0 + $0x58] sm:$0xff]  }
   0xb   :  { %1316 = vmatpush3.bf16.msra.mxu0 %v1409_v2  ;;  %1401 = vmatpush3.bf16.msra.mxu1 %v1409_v2  ;;  %v1441_v29 = vld [vmem:[%s1983_s0 + $0xd0] sm:$0xff]   ;;  %v1442_v31 = vld [vmem:[%s1983_s0 + $0xd8] sm:$0xff]   ;;  %v1427_v32 = vld [vmem:[%s1983_s0 + $0x60] sm:$0xff]  }
   0xc   :  { %1317 = vmatprep.subr.bf16.mxu0 %v1410_v3  ;;  %1394 = vmatprep.subr.bf16.mxu1 %v1410_v3  ;;  %v1443_v33 = vld [vmem:[%s1983_s0 + $0xe0] sm:$0xff]   ;;  %v1428_v34 = vld [vmem:[%s1983_s0 + $0x68] sm:$0xff]   ;;  %v1429_v36 = vld [vmem:[%s1983_s0 + $0x70] sm:$0xff]  }
   0xd   :  { %v1444_v35 = vld [vmem:[%s1983_s0 + $0xe8] sm:$0xff]   ;;  %v1445_v37 = vld [vmem:[%s1983_s0 + $0xf0] sm:$0xff]   ;;  %v1430_v38 = vld [vmem:[%s1983_s0 + $0x78] sm:$0xff]  }
   0xe   :  { %v1446_v39 = vld [vmem:[%s1983_s0 + $0xf8] sm:$0xff]  }
   0xf   :  { %1318 = vmatpush3.bf16.msra.mxu0 %v1410_v3  ;;  %1402 = vmatpush3.bf16.msra.mxu1 %v1410_v3 }
  0x10   :  { %1319 = vmatprep.subr.bf16.mxu0 %v1411_v5  ;;  %1395 = vmatprep.subr.bf16.mxu1 %v1411_v5 }
  0x13   :  { %1320 = vmatpush3.bf16.msra.mxu0 %v1411_v5  ;;  %1403 = vmatpush3.bf16.msra.mxu1 %v1411_v5 }
  0x14   :  { %1321 = vmatprep.subr.bf16.mxu0 %v1412_v6  ;;  %1396 = vmatprep.subr.bf16.mxu1 %v1412_v6 }
  0x17   :  { %1322 = vmatpush3.bf16.msra.mxu0 %v1412_v6  ;;  %1404 = vmatpush3.bf16.msra.mxu1 %v1412_v6 }
  0x18   :  { %1323 = vmatprep.subr.bf16.mxu0 %v1413_v7  ;;  %1397 = vmatprep.subr.bf16.mxu1 %v1413_v7 }
  0x1b   :  { %1324 = vmatpush3.bf16.msra.mxu0 %v1413_v7  ;;  %1405 = vmatpush3.bf16.msra.mxu1 %v1413_v7 }
  0x1c   :  { %1325 = vmatprep.subr.bf16.mxu0 %v1414_v8  ;;  %1398 = vmatprep.subr.bf16.mxu1 %v1414_v8 }
  0x1f   :  { %1326 = vmatpush3.bf16.msra.mxu0 %v1414_v8  ;;  %1406 = vmatpush3.bf16.msra.mxu1 %v1414_v8 }
  0x22   :  { %1328 = vmatmul.mubr.bf16.vlgmr.msra.gmra.mrb[0].mxu0 %v1416_v10  ;;  %1360 = vmatmul.mubr.bf16.vlgmr.msra.gmra.mrb[0].mxu1 %v1432_v12 }
  0x23   :  { %1331 = vmatprep.mubr.bf16.mxu0 %v1417_v11  ;;  %1363 = vmatprep.mubr.bf16.mxu1 %v1433_v13 }
  0x2a   :  { %1332 = vmatmul.mubr.bf16.gmra.mrb[4].mxu0 %v1418_v14  ;;  %1364 = vmatmul.mubr.bf16.gmra.mrb[4].mxu1 %v1434_v16 }
  0x2b   :  { %1335 = vmatprep.mubr.bf16.mxu0 %v1419_v15  ;;  %1367 = vmatprep.mubr.bf16.mxu1 %v1435_v17 }
  0x32   :  { %1336 = vmatmul.mubr.bf16.gmra.mrb[8].mxu0 %v1420_v18  ;;  %1368 = vmatmul.mubr.bf16.gmra.mrb[8].mxu1 %v1436_v19 }
  0x33   :  { %1339 = vmatprep.mubr.bf16.mxu0 %v1421_v20  ;;  %1371 = vmatprep.mubr.bf16.mxu1 %v1437_v21 }
  0x3a   :  { %1340 = vmatmul.mubr.bf16.gmra.mrb[12].mxu0 %v1422_v22  ;;  %1372 = vmatmul.mubr.bf16.gmra.mrb[12].mxu1 %v1438_v23 }
  0x3b   :  { %1343 = vmatprep.mubr.bf16.mxu0 %v1423_v24  ;;  %1375 = vmatprep.mubr.bf16.mxu1 %v1439_v25 }
  0x42   :  { %1344 = vmatmul.mubr.bf16.gmra.mrb[16].mxu0 %v1424_v26  ;;  %1376 = vmatmul.mubr.bf16.gmra.mrb[16].mxu1 %v1440_v27 }
  0x43   :  { %1347 = vmatprep.mubr.bf16.mxu0 %v1425_v28  ;;  %1379 = vmatprep.mubr.bf16.mxu1 %v1441_v29 }
  0x4a   :  { %1348 = vmatmul.mubr.bf16.gmra.mrb[20].mxu0 %v1426_v30  ;;  %1380 = vmatmul.mubr.bf16.gmra.mrb[20].mxu1 %v1442_v31 }
  0x4b   :  { %1351 = vmatprep.mubr.bf16.mxu0 %v1427_v32  ;;  %1383 = vmatprep.mubr.bf16.mxu1 %v1443_v33 }
  0x52   :  { %1352 = vmatmul.mubr.bf16.gmra.mrb[24].mxu0 %v1428_v34  ;;  %1384 = vmatmul.mubr.bf16.gmra.mrb[24].mxu1 %v1444_v35 }
  0x53   :  { %1355 = vmatprep.mubr.bf16.mxu0 %v1429_v36  ;;  %1387 = vmatprep.mubr.bf16.mxu1 %v1445_v37 }
  0x5a   :  { %1356 = vmatmul.mubr.bf16.gmra.mrb[28].mxu0 %v1430_v38  ;;  %1388 = vmatmul.mubr.bf16.gmra.mrb[28].mxu1 %v1446_v39 }
  0xf5   :  { %v1329_v40 = vpop.f32.mrb[0].mxu0  ;;  %v1592_v41 = vpop.f32.mrb[0].mxu1 }
  0xf6   :  { %953 = vst [vmem:[%s1984_s2 + $0x10] sm:$0xff] %v1329_v40  ;;  %v501_v42 = vpop.f32.mrb[1].mxu0  ;;  %985 = vst [vmem:[%s1984_s2 + $0x110] sm:$0xff] %v1592_v41  ;;  %v1601_v43 = vpop.f32.mrb[1].mxu1  ;;  %v1086_v51 = vmul.f32 %v1329_v40, %v1329_v40 }
  0xf7   :  { %951 = vst [vmem:[%s1984_s2] sm:$0xff] %v501_v42  ;;  %v1330_v44 = vpop.f32.mrb[2].mxu0  ;;  %983 = vst [vmem:[%s1984_s2 + $0x100] sm:$0xff] %v1601_v43  ;;  %v1610_v45 = vpop.f32.mrb[2].mxu1  ;;  %v1084_v48 = vmul.f32 %v501_v42, %v501_v42 }
  0xf8   :  { %954 = vst [vmem:[%s1984_s2 + $0x18] sm:$0xff] %v1330_v44  ;;  %v504_v46 = vpop.f32.mrb[3].mxu0  ;;  %986 = vst [vmem:[%s1984_s2 + $0x118] sm:$0xff] %v1610_v45  ;;  %v1619_v47 = vpop.f32.mrb[3].mxu1  ;;  %v1087_v54 = vmul.f32 %v1330_v44, %v1330_v44 }
  0xf9   :  { %952 = vst [vmem:[%s1984_s2 + $0x8] sm:$0xff] %v504_v46  ;;  %v1015_v49 = vadd.f32 %v504_v46, %v501_v42  ;;  %v1085_v50 = vmul.f32 %v504_v46, %v504_v46  ;;  %984 = vst [vmem:[%s1984_s2 + $0x108] sm:$0xff] %v1619_v47 }
  0xfb   :  { %v1016_v52 = vadd.f32 %v1329_v40, %v1015_v49  ;;  %v1148_v53 = vadd.f32 %v1085_v50, %v1084_v48 }
  0xfd   :  { %v1149_v55 = vadd.f32 %v1148_v53, %v1086_v51  ;;  %v1333_v56 = vpop.f32.mrb[4].mxu0  ;;  %v1017_v57 = vadd.f32 %v1330_v44, %v1016_v52  ;;  %v1628_v58 = vpop.f32.mrb[4].mxu1 }
  0xfe   :  { %957 = vst [vmem:[%s1984_s2 + $0x30] sm:$0xff] %v1333_v56  ;;  %v517_v59 = vpop.f32.mrb[5].mxu0  ;;  %989 = vst [vmem:[%s1984_s2 + $0x130] sm:$0xff] %v1628_v58  ;;  %v1637_v60 = vpop.f32.mrb[5].mxu1  ;;  %v1090_v7 = vmul.f32 %v1333_v56, %v1333_v56 }
  0xff   :  { %955 = vst [vmem:[%s1984_s2 + $0x20] sm:$0xff] %v517_v59  ;;  %v1018_v61 = vadd.f32 %v1017_v57, %v517_v59  ;;  %v1088_v62 = vmul.f32 %v517_v59, %v517_v59  ;;  %v1150_v63 = vadd.f32 %v1149_v55, %v1087_v54  ;;  %v1334_v0 = vpop.f32.mrb[6].mxu0  ;;  %987 = vst [vmem:[%s1984_s2 + $0x120] sm:$0xff] %v1637_v60  ;;  %v1646_v1 = vpop.f32.mrb[6].mxu1 }
 0x100   :  { %958 = vst [vmem:[%s1984_s2 + $0x38] sm:$0xff] %v1334_v0  ;;  %v520_v2 = vpop.f32.mrb[7].mxu0  ;;  %990 = vst [vmem:[%s1984_s2 + $0x138] sm:$0xff] %v1646_v1  ;;  %v1655_v3 = vpop.f32.mrb[7].mxu1  ;;  %v1091_v10 = vmul.f32 %v1334_v0, %v1334_v0 }
 0x101   :  { %v1151_v4 = vadd.f32 %v1150_v63, %v1088_v62  ;;  %956 = vst [vmem:[%s1984_s2 + $0x28] sm:$0xff] %v520_v2  ;;  %v1019_v5 = vadd.f32 %v1018_v61, %v520_v2  ;;  %v1089_v6 = vmul.f32 %v520_v2, %v520_v2  ;;  %988 = vst [vmem:[%s1984_s2 + $0x128] sm:$0xff] %v1655_v3 }
 0x103   :  { %v1020_v8 = vadd.f32 %v1333_v56, %v1019_v5  ;;  %v1152_v9 = vadd.f32 %v1151_v4, %v1089_v6 }
 0x105   :  { %v1153_v11 = vadd.f32 %v1152_v9, %v1090_v7  ;;  %v1337_v12 = vpop.f32.mrb[8].mxu0  ;;  %v1021_v13 = vadd.f32 %v1334_v0, %v1020_v8  ;;  %v1664_v14 = vpop.f32.mrb[8].mxu1 }
 0x106   :  { %961 = vst [vmem:[%s1984_s2 + $0x50] sm:$0xff] %v1337_v12  ;;  %v533_v15 = vpop.f32.mrb[9].mxu0  ;;  %993 = vst [vmem:[%s1984_s2 + $0x150] sm:$0xff] %v1664_v14  ;;  %v1673_v16 = vpop.f32.mrb[9].mxu1  ;;  %v1094_v27 = vmul.f32 %v1337_v12, %v1337_v12 }
 0x107   :  { %959 = vst [vmem:[%s1984_s2 + $0x40] sm:$0xff] %v533_v15  ;;  %v1022_v17 = vadd.f32 %v1021_v13, %v533_v15  ;;  %v1092_v18 = vmul.f32 %v533_v15, %v533_v15  ;;  %v1154_v19 = vadd.f32 %v1153_v11, %v1091_v10  ;;  %v1338_v20 = vpop.f32.mrb[10].mxu0  ;;  %991 = vst [vmem:[%s1984_s2 + $0x140] sm:$0xff] %v1673_v16  ;;  %v1682_v21 = vpop.f32.mrb[10].mxu1 }
 0x108   :  { %962 = vst [vmem:[%s1984_s2 + $0x58] sm:$0xff] %v1338_v20  ;;  %v536_v22 = vpop.f32.mrb[11].mxu0  ;;  %994 = vst [vmem:[%s1984_s2 + $0x158] sm:$0xff] %v1682_v21  ;;  %v1691_v23 = vpop.f32.mrb[11].mxu1  ;;  %v1095_v30 = vmul.f32 %v1338_v20, %v1338_v20 }
 0x109   :  { %v1155_v24 = vadd.f32 %v1154_v19, %v1092_v18  ;;  %960 = vst [vmem:[%s1984_s2 + $0x48] sm:$0xff] %v536_v22  ;;  %v1023_v25 = vadd.f32 %v1022_v17, %v536_v22  ;;  %v1093_v26 = vmul.f32 %v536_v22, %v536_v22  ;;  %992 = vst [vmem:[%s1984_s2 + $0x148] sm:$0xff] %v1691_v23 }
 0x10b   :  { %v1024_v28 = vadd.f32 %v1337_v12, %v1023_v25  ;;  %v1156_v29 = vadd.f32 %v1155_v24, %v1093_v26 }
 0x10d   :  { %v1157_v31 = vadd.f32 %v1156_v29, %v1094_v27  ;;  %v1341_v32 = vpop.f32.mrb[12].mxu0  ;;  %v1025_v33 = vadd.f32 %v1338_v20, %v1024_v28  ;;  %v1700_v34 = vpop.f32.mrb[12].mxu1 }
 0x10e   :  { %965 = vst [vmem:[%s1984_s2 + $0x70] sm:$0xff] %v1341_v32  ;;  %v549_v35 = vpop.f32.mrb[13].mxu0  ;;  %997 = vst [vmem:[%s1984_s2 + $0x170] sm:$0xff] %v1700_v34  ;;  %v1709_v36 = vpop.f32.mrb[13].mxu1  ;;  %v1098_v51 = vmul.f32 %v1341_v32, %v1341_v32 }
 0x10f   :  { %963 = vst [vmem:[%s1984_s2 + $0x60] sm:$0xff] %v549_v35  ;;  %v1026_v37 = vadd.f32 %v1025_v33, %v549_v35  ;;  %v1096_v38 = vmul.f32 %v549_v35, %v549_v35  ;;  %v1158_v39 = vadd.f32 %v1157_v31, %v1095_v30  ;;  %v1342_v40 = vpop.f32.mrb[14].mxu0  ;;  %995 = vst [vmem:[%s1984_s2 + $0x160] sm:$0xff] %v1709_v36  ;;  %v1718_v42 = vpop.f32.mrb[14].mxu1 }
 0x110   :  { %966 = vst [vmem:[%s1984_s2 + $0x78] sm:$0xff] %v1342_v40  ;;  %v552_v44 = vpop.f32.mrb[15].mxu0  ;;  %998 = vst [vmem:[%s1984_s2 + $0x178] sm:$0xff] %v1718_v42  ;;  %v1727_v46 = vpop.f32.mrb[15].mxu1  ;;  %v1099_v54 = vmul.f32 %v1342_v40, %v1342_v40 }
 0x111   :  { %v1159_v48 = vadd.f32 %v1158_v39, %v1096_v38  ;;  %964 = vst [vmem:[%s1984_s2 + $0x68] sm:$0xff] %v552_v44  ;;  %v1027_v49 = vadd.f32 %v1026_v37, %v552_v44  ;;  %v1097_v50 = vmul.f32 %v552_v44, %v552_v44  ;;  %996 = vst [vmem:[%s1984_s2 + $0x168] sm:$0xff] %v1727_v46 }
 0x113   :  { %v1028_v52 = vadd.f32 %v1341_v32, %v1027_v49  ;;  %v1160_v53 = vadd.f32 %v1159_v48, %v1097_v50 }
 0x115   :  { %v1161_v55 = vadd.f32 %v1160_v53, %v1098_v51  ;;  %v1345_v56 = vpop.f32.mrb[16].mxu0  ;;  %v1029_v57 = vadd.f32 %v1342_v40, %v1028_v52  ;;  %v1736_v59 = vpop.f32.mrb[16].mxu1 }
 0x116   :  { %969 = vst [vmem:[%s1984_s2 + $0x90] sm:$0xff] %v1345_v56  ;;  %v565_v61 = vpop.f32.mrb[17].mxu0  ;;  %1001 = vst [vmem:[%s1984_s2 + $0x190] sm:$0xff] %v1736_v59  ;;  %v1745_v62 = vpop.f32.mrb[17].mxu1  ;;  %v1102_v11 = vmul.f32 %v1345_v56, %v1345_v56 }
 0x117   :  { %967 = vst [vmem:[%s1984_s2 + $0x80] sm:$0xff] %v565_v61  ;;  %v1030_v63 = vadd.f32 %v1029_v57, %v565_v61  ;;  %v1100_v0 = vmul.f32 %v565_v61, %v565_v61  ;;  %v1162_v2 = vadd.f32 %v1161_v55, %v1099_v54  ;;  %v1346_v4 = vpop.f32.mrb[18].mxu0  ;;  %999 = vst [vmem:[%s1984_s2 + $0x180] sm:$0xff] %v1745_v62  ;;  %v1754_v5 = vpop.f32.mrb[18].mxu1 }
 0x118   :  { %970 = vst [vmem:[%s1984_s2 + $0x98] sm:$0xff] %v1346_v4  ;;  %v568_v6 = vpop.f32.mrb[19].mxu0  ;;  %1002 = vst [vmem:[%s1984_s2 + $0x198] sm:$0xff] %v1754_v5  ;;  %v1763_v7 = vpop.f32.mrb[19].mxu1  ;;  %v1103_v15 = vmul.f32 %v1346_v4, %v1346_v4 }
 0x119   :  { %v1163_v8 = vadd.f32 %v1162_v2, %v1100_v0  ;;  %968 = vst [vmem:[%s1984_s2 + $0x88] sm:$0xff] %v568_v6  ;;  %v1031_v9 = vadd.f32 %v1030_v63, %v568_v6  ;;  %v1101_v10 = vmul.f32 %v568_v6, %v568_v6  ;;  %1000 = vst [vmem:[%s1984_s2 + $0x188] sm:$0xff] %v1763_v7 }
 0x11b   :  { %v1032_v12 = vadd.f32 %v1345_v56, %v1031_v9  ;;  %v1164_v13 = vadd.f32 %v1163_v8, %v1101_v10 }
 0x11d   :  { %v1165_v17 = vadd.f32 %v1164_v13, %v1102_v11  ;;  %v1349_v18 = vpop.f32.mrb[20].mxu0  ;;  %v1033_v19 = vadd.f32 %v1346_v4, %v1032_v12  ;;  %v1772_v20 = vpop.f32.mrb[20].mxu1 }
 0x11e   :  { %973 = vst [vmem:[%s1984_s2 + $0xb0] sm:$0xff] %v1349_v18  ;;  %v581_v22 = vpop.f32.mrb[21].mxu0  ;;  %1005 = vst [vmem:[%s1984_s2 + $0x1b0] sm:$0xff] %v1772_v20  ;;  %v1781_v24 = vpop.f32.mrb[21].mxu1  ;;  %v1106_v37 = vmul.f32 %v1349_v18, %v1349_v18 }
 0x11f   :  { %971 = vst [vmem:[%s1984_s2 + $0xa0] sm:$0xff] %v581_v22  ;;  %v1034_v25 = vadd.f32 %v1033_v19, %v581_v22  ;;  %v1104_v26 = vmul.f32 %v581_v22, %v581_v22  ;;  %v1166_v27 = vadd.f32 %v1165_v17, %v1103_v15  ;;  %v1350_v28 = vpop.f32.mrb[22].mxu0  ;;  %1003 = vst [vmem:[%s1984_s2 + $0x1a0] sm:$0xff] %v1781_v24  ;;  %v1790_v29 = vpop.f32.mrb[22].mxu1 }
 0x120   :  { %974 = vst [vmem:[%s1984_s2 + $0xb8] sm:$0xff] %v1350_v28  ;;  %v584_v30 = vpop.f32.mrb[23].mxu0  ;;  %1006 = vst [vmem:[%s1984_s2 + $0x1b8] sm:$0xff] %v1790_v29  ;;  %v1799_v31 = vpop.f32.mrb[23].mxu1  ;;  %v1107_v40 = vmul.f32 %v1350_v28, %v1350_v28 }
 0x121   :  { %v1167_v32 = vadd.f32 %v1166_v27, %v1104_v26  ;;  %972 = vst [vmem:[%s1984_s2 + $0xa8] sm:$0xff] %v584_v30  ;;  %v1035_v33 = vadd.f32 %v1034_v25, %v584_v30  ;;  %v1105_v35 = vmul.f32 %v584_v30, %v584_v30  ;;  %1004 = vst [vmem:[%s1984_s2 + $0x1a8] sm:$0xff] %v1799_v31 }
 0x123   :  { %v1036_v38 = vadd.f32 %v1349_v18, %v1035_v33  ;;  %v1168_v39 = vadd.f32 %v1167_v32, %v1105_v35 }
 0x125   :  { %v1169_v44 = vadd.f32 %v1168_v39, %v1106_v37  ;;  %v1353_v48 = vpop.f32.mrb[24].mxu0  ;;  %v1037_v49 = vadd.f32 %v1350_v28, %v1036_v38  ;;  %v1808_v50 = vpop.f32.mrb[24].mxu1 }
 0x126   :  { %977 = vst [vmem:[%s1984_s2 + $0xd0] sm:$0xff] %v1353_v48  ;;  %v597_v51 = vpop.f32.mrb[25].mxu0  ;;  %1009 = vst [vmem:[%s1984_s2 + $0x1d0] sm:$0xff] %v1808_v50  ;;  %v1817_v52 = vpop.f32.mrb[25].mxu1  ;;  %v1110_v6 = vmul.f32 %v1353_v48, %v1353_v48 }
 0x127   :  { %975 = vst [vmem:[%s1984_s2 + $0xc0] sm:$0xff] %v597_v51  ;;  %v1038_v53 = vadd.f32 %v1037_v49, %v597_v51  ;;  %v1108_v54 = vmul.f32 %v597_v51, %v597_v51  ;;  %v1170_v55 = vadd.f32 %v1169_v44, %v1107_v40  ;;  %v1354_v56 = vpop.f32.mrb[26].mxu0  ;;  %1007 = vst [vmem:[%s1984_s2 + $0x1c0] sm:$0xff] %v1817_v52  ;;  %v1826_v57 = vpop.f32.mrb[26].mxu1 }
 0x128   :  { %978 = vst [vmem:[%s1984_s2 + $0xd8] sm:$0xff] %v1354_v56  ;;  %v600_v61 = vpop.f32.mrb[27].mxu0  ;;  %1010 = vst [vmem:[%s1984_s2 + $0x1d8] sm:$0xff] %v1826_v57  ;;  %v1835_v63 = vpop.f32.mrb[27].mxu1  ;;  %v1111_v10 = vmul.f32 %v1354_v56, %v1354_v56  ;;  %v1116_v49 = vmul.f32 %v1601_v43, %v1601_v43 }
 0x129   :  { %v1171_v0 = vadd.f32 %v1170_v55, %v1108_v54  ;;  %976 = vst [vmem:[%s1984_s2 + $0xc8] sm:$0xff] %v600_v61  ;;  %v1039_v2 = vadd.f32 %v1038_v53, %v600_v61  ;;  %v1109_v4 = vmul.f32 %v600_v61, %v600_v61  ;;  %1008 = vst [vmem:[%s1984_s2 + $0x1c8] sm:$0xff] %v1835_v63 }
 0x12a   :  { %v1118_v61 = vmul.f32 %v1592_v41, %v1592_v41 }
 0x12b   :  { %v1040_v8 = vadd.f32 %v1353_v48, %v1039_v2  ;;  %v1172_v9 = vadd.f32 %v1171_v0, %v1109_v4  ;;  %v1119_v4 = vmul.f32 %v1610_v45, %v1610_v45 }
 0x12d   :  { %v1173_v11 = vadd.f32 %v1172_v9, %v1110_v6  ;;  %v1357_v12 = vpop.f32.mrb[28].mxu0  ;;  %v1041_v13 = vadd.f32 %v1354_v56, %v1040_v8  ;;  %v1844_v15 = vpop.f32.mrb[28].mxu1  ;;  %v1117_v56 = vmul.f32 %v1619_v47, %v1619_v47 }
 0x12e   :  { %981 = vst [vmem:[%s1984_s2 + $0xf0] sm:$0xff] %v1357_v12  ;;  %v613_v17 = vpop.f32.mrb[29].mxu0  ;;  %1013 = vst [vmem:[%s1984_s2 + $0x1f0] sm:$0xff] %v1844_v15  ;;  %v1853_v18 = vpop.f32.mrb[29].mxu1  ;;  %v1114_v37 = vmul.f32 %v1357_v12, %v1357_v12 }
 0x12f   :  { %979 = vst [vmem:[%s1984_s2 + $0xe0] sm:$0xff] %v613_v17  ;;  %v1042_v19 = vadd.f32 %v1041_v13, %v613_v17  ;;  %v1112_v22 = vmul.f32 %v613_v17, %v613_v17  ;;  %v1174_v25 = vadd.f32 %v1173_v11, %v1111_v10  ;;  %v1358_v26 = vpop.f32.mrb[30].mxu0  ;;  %1011 = vst [vmem:[%s1984_s2 + $0x1e0] sm:$0xff] %v1853_v18  ;;  %v1862_v27 = vpop.f32.mrb[30].mxu1 }
 0x130   :  { %982 = vst [vmem:[%s1984_s2 + $0xf8] sm:$0xff] %v1358_v26  ;;  %v616_v28 = vpop.f32.mrb[31].mxu0  ;;  %1014 = vst [vmem:[%s1984_s2 + $0x1f8] sm:$0xff] %v1862_v27  ;;  %v1871_v30 = vpop.f32.mrb[31].mxu1  ;;  %v1115_v40 = vmul.f32 %v1358_v26, %v1358_v26 }
 0x131   :  { %v1175_v32 = vadd.f32 %v1174_v25, %v1112_v22  ;;  %980 = vst [vmem:[%s1984_s2 + $0xe8] sm:$0xff] %v616_v28  ;;  %v1043_v33 = vadd.f32 %v1042_v19, %v616_v28  ;;  %v1113_v35 = vmul.f32 %v616_v28, %v616_v28  ;;  %1012 = vst [vmem:[%s1984_s2 + $0x1e8] sm:$0xff] %v1871_v30 }
 0x133   :  { %v1044_v38 = vadd.f32 %v1357_v12, %v1043_v33  ;;  %v1176_v39 = vadd.f32 %v1175_v32, %v1113_v35  ;;  %v1121_v12 = vmul.f32 %v1655_v3, %v1655_v3  ;;  %v1125_v32 = vmul.f32 %v1691_v23, %v1691_v23 }
 0x135   :  { %v1177_v44 = vadd.f32 %v1176_v39, %v1114_v37  ;;  %v1045_v48 = vadd.f32 %v1358_v26, %v1044_v38 }
 0x137   :  { %v1046_v51 = vadd.f32 %v1045_v48, %v1601_v43  ;;  %v1178_v53 = vadd.f32 %v1177_v44, %v1115_v40  ;;  %v1120_v43 = vmul.f32 %v1637_v60, %v1637_v60  ;;  %v1129_v48 = vmul.f32 %v1727_v46, %v1727_v46 }
 0x139   :  { %v1179_v54 = vadd.f32 %v1178_v53, %v1116_v49  ;;  %v1047_v55 = vadd.f32 %v1046_v51, %v1619_v47 }
 0x13b   :  { %v1048_v0 = vadd.f32 %v1592_v41, %v1047_v55  ;;  %v1180_v2 = vadd.f32 %v1179_v54, %v1117_v56  ;;  %v1122_v41 = vmul.f32 %v1628_v58, %v1628_v58 }
 0x13d   :  { %v1181_v6 = vadd.f32 %v1180_v2, %v1118_v61  ;;  %v1049_v8 = vadd.f32 %v1610_v45, %v1048_v0  ;;  %v1123_v45 = vmul.f32 %v1646_v1, %v1646_v1  ;;  %v1133_v0 = vmul.f32 %v1763_v7, %v1763_v7 }
 0x13f   :  { %v1050_v9 = vadd.f32 %v1049_v8, %v1637_v60  ;;  %v1182_v10 = vadd.f32 %v1181_v6, %v1119_v4  ;;  %v1124_v60 = vmul.f32 %v1673_v16, %v1673_v16 }
 0x141   :  { %v1183_v11 = vadd.f32 %v1182_v10, %v1120_v43  ;;  %v1051_v47 = vadd.f32 %v1050_v9, %v1655_v3 }
 0x143   :  { %v1052_v13 = vadd.f32 %v1628_v58, %v1051_v47  ;;  %v1184_v17 = vadd.f32 %v1183_v11, %v1121_v12  ;;  %v1126_v58 = vmul.f32 %v1664_v14, %v1664_v14  ;;  %v1137_v11 = vmul.f32 %v1799_v31, %v1799_v31 }
 0x145   :  { %v1185_v19 = vadd.f32 %v1184_v17, %v1122_v41  ;;  %v1053_v22 = vadd.f32 %v1646_v1, %v1052_v13  ;;  %v1127_v1 = vmul.f32 %v1682_v21, %v1682_v21 }
 0x147   :  { %v1054_v25 = vadd.f32 %v1053_v22, %v1673_v16  ;;  %v1186_v26 = vadd.f32 %v1185_v19, %v1123_v45  ;;  %v1128_v16 = vmul.f32 %v1709_v36, %v1709_v36  ;;  %v1141_v22 = vmul.f32 %v1835_v63, %v1835_v63 }
 0x149   :  { %v1187_v28 = vadd.f32 %v1186_v26, %v1124_v60  ;;  %v1055_v3 = vadd.f32 %v1054_v25, %v1691_v23 }
 0x14b   :  { %v1056_v33 = vadd.f32 %v1664_v14, %v1055_v3  ;;  %v1188_v35 = vadd.f32 %v1187_v28, %v1125_v32  ;;  %v1130_v14 = vmul.f32 %v1700_v34, %v1700_v34 }
 0x14d   :  { %v1189_v37 = vadd.f32 %v1188_v35, %v1126_v58  ;;  %v1057_v38 = vadd.f32 %v1682_v21, %v1056_v33  ;;  %v1131_v21 = vmul.f32 %v1718_v42, %v1718_v42  ;;  %v1145_v33 = vmul.f32 %v1871_v30, %v1871_v30 }
 0x14f   :  { %v1058_v39 = vadd.f32 %v1057_v38, %v1709_v36  ;;  %v1190_v40 = vadd.f32 %v1189_v37, %v1127_v1  ;;  %v1132_v36 = vmul.f32 %v1745_v62, %v1745_v62 }
 0x151   :  { %v1191_v44 = vadd.f32 %v1190_v40, %v1128_v16  ;;  %v1059_v23 = vadd.f32 %v1058_v39, %v1727_v46 }
 0x153   :  { %v1060_v49 = vadd.f32 %v1700_v34, %v1059_v23  ;;  %v1192_v51 = vadd.f32 %v1191_v44, %v1129_v48  ;;  %v1134_v34 = vmul.f32 %v1736_v59, %v1736_v59 }
 0x155   :  { %v1193_v53 = vadd.f32 %v1192_v51, %v1130_v14  ;;  %v1061_v54 = vadd.f32 %v1718_v42, %v1060_v49  ;;  %v1135_v42 = vmul.f32 %v1754_v5, %v1754_v5 }
 0x157   :  { %v1062_v55 = vadd.f32 %v1061_v54, %v1745_v62  ;;  %v1194_v56 = vadd.f32 %v1193_v53, %v1131_v21  ;;  %v1136_v62 = vmul.f32 %v1781_v24, %v1781_v24 }
 0x159   :  { %v1195_v61 = vadd.f32 %v1194_v56, %v1132_v36  ;;  %v1063_v46 = vadd.f32 %v1062_v55, %v1763_v7 }
 0x15b   :  { %v1064_v2 = vadd.f32 %v1736_v59, %v1063_v46  ;;  %v1196_v4 = vadd.f32 %v1195_v61, %v1133_v0  ;;  %v1138_v59 = vmul.f32 %v1772_v20, %v1772_v20 }
 0x15d   :  { %v1197_v6 = vadd.f32 %v1196_v4, %v1134_v34  ;;  %v1065_v8 = vadd.f32 %v1754_v5, %v1064_v2  ;;  %v1139_v5 = vmul.f32 %v1790_v29, %v1790_v29 }
 0x15f   :  { %v1066_v43 = vadd.f32 %v1065_v8, %v1781_v24  ;;  %v1198_v9 = vadd.f32 %v1197_v6, %v1135_v42  ;;  %v1140_v24 = vmul.f32 %v1817_v52, %v1817_v52 }
 0x161   :  { %v1199_v10 = vadd.f32 %v1198_v9, %v1136_v62  ;;  %v1067_v7 = vadd.f32 %v1066_v43, %v1799_v31 }
 0x163   :  { %v1068_v47 = vadd.f32 %v1772_v20, %v1067_v7  ;;  %v1200_v12 = vadd.f32 %v1199_v10, %v1137_v11  ;;  %v1142_v20 = vmul.f32 %v1808_v50, %v1808_v50 }
 0x165   :  { %v1201_v41 = vadd.f32 %v1200_v12, %v1138_v59  ;;  %v1069_v13 = vadd.f32 %v1790_v29, %v1068_v47  ;;  %v1143_v29 = vmul.f32 %v1826_v57, %v1826_v57 }
 0x167   :  { %v1070_v17 = vadd.f32 %v1069_v13, %v1817_v52  ;;  %v1202_v45 = vadd.f32 %v1201_v41, %v1139_v5  ;;  %v1144_v52 = vmul.f32 %v1853_v18, %v1853_v18 }
 0x169   :  { %v1203_v19 = vadd.f32 %v1202_v45, %v1140_v24  ;;  %v1071_v31 = vadd.f32 %v1070_v17, %v1835_v63 }
 0x16b   :  { %v1072_v60 = vadd.f32 %v1808_v50, %v1071_v31  ;;  %v1204_v25 = vadd.f32 %v1203_v19, %v1141_v22  ;;  %v1146_v50 = vmul.f32 %v1844_v15, %v1844_v15 }
 0x16d   :  { %v1205_v26 = vadd.f32 %v1204_v25, %v1142_v20  ;;  %v1073_v28 = vadd.f32 %v1826_v57, %v1072_v60  ;;  %v1147_v57 = vmul.f32 %v1862_v27, %v1862_v27 }
 0x16f   :  { %v1074_v3 = vadd.f32 %v1073_v28, %v1853_v18  ;;  %v1206_v32 = vadd.f32 %v1205_v26, %v1143_v29 }
 0x171   :  { %v1207_v58 = vadd.f32 %v1206_v32, %v1144_v52  ;;  %v1075_v63 = vadd.f32 %v1074_v3, %v1871_v30 }
 0x173   :  { %v1076_v35 = vadd.f32 %v1844_v15, %v1075_v63  ;;  %v1208_v1 = vadd.f32 %v1207_v58, %v1145_v33 }
 0x175   :  { %v1077_v37 = vadd.f32 %v1862_v27, %v1076_v35  ;;  %v1209_v38 = vadd.f32 %v1208_v1, %v1146_v50 }
 0x177   :  { %v1078_v18 = vrot.slane %v1077_v37, 4  ;;  %v1210_v16 = vadd.f32 %v1209_v38, %v1147_v57 }
 0x179   :  { %v1079_v39 = vadd.f32 %v1078_v18, %v1077_v37  ;;  %v1211_v40 = vrot.slane %v1210_v16, 4 }
 0x17b   :  { %v1080_v44 = vrot.slane %v1079_v39, 2  ;;  %v1212_v23 = vadd.f32 %v1211_v40, %v1210_v16 }
 0x17d   :  { %v1081_v48 = vadd.f32 %v1080_v44, %v1079_v39  ;;  %v1213_v30 = vrot.slane %v1212_v23, 2 }
 0x17f   :  { %v1082_v14 = vrot.slane %v1081_v48, 1  ;;  %v1214_v49 = vadd.f32 %v1213_v30, %v1212_v23 }
 0x181   :  { %v1083_v51 = vadd.f32 %v1082_v14, %v1081_v48  ;;  %v1215_v21 = vrot.slane %v1214_v49, 1 }
 0x183   :  { %v1216_v15 = vadd.f32 %v1215_v21, %v1214_v49  ;;  %1217 = vst [vmem:[%s1985_s3] sm:$0xff] %v1083_v51 }
 0x185   :  { %1218 = vst [vmem:[%s1986_s4] sm:$0xff] %v1216_v15 }

</bundles_post_ra>
